<compile_context>
chip_gen: v6e
topology: v6e:2x2x1
jax: 0.10.0
libtpu: 0.0.40
codegen_flags: <defaults>
</compile_context>

<pallas_src>
import jax
import jax.numpy as jnp
from jax import lax
from jax.experimental import pallas as pl
from jax.experimental.pallas import tpu as pltpu


def _round_up(x: int, m: int) -> int:
    return ((x + m - 1) // m) * m


def _rnn_seq_kernel(
    xz_ref,     # [T, BP, NL]  hoisted input projection x_t @ W_x + b_cat
    h0_ref,     # [BP, NL]     initial hidden (lanes [0:H) real, rest 0)
    wh_ref,     # [NL, NL]     recurrent weight slab (rows >= H are zero)
    woo_ref,    # [NL, NL]     o2o weight slab (cols >= O are zero)
    boo_ref,    # [1, NL]      o2o bias, padded lanes = -1e30 (softmax mask)
    out_ref,    # [T, BP, NL]  per-step log-probabilities (padded)
    hfin_ref,   # [BP, NL]     final hidden carry (lanes [0:H) = final new_h)
    zs_ref,     # [T, BP, NL]  VMEM scratch: all per-step z slabs
):
    T, BP, NL = zs_ref.shape
    wh = wh_ref[...]                     # resident weight, loaded once

    # ---- Phase 1: serial recurrence (only the h-dependent matmul). --------
    def step(t, h):
        z = xz_ref[t] + jnp.dot(h, wh, preferred_element_type=jnp.float32)
        zs_ref[t] = z
        return z                          # carry full slab: W_h rows >= H are 0

    h_final = lax.fori_loop(0, T, step, h0_ref[...], unroll=True)
    hfin_ref[...] = h_final

    # ---- Phase 2: batched output projection + log-softmax over all T*BP. --
    z_all = zs_ref[...].reshape(T * BP, NL)
    out2 = (
        jnp.dot(z_all, woo_ref[...], preferred_element_type=jnp.float32)
        + boo_ref[...]
    )                                     # padded lanes == exactly -1e30

    # dropout(p=0.1): eval-mode identity (inference).

    m = jnp.max(out2, axis=-1, keepdims=True)
    shifted = out2 - m
    lse = jnp.log(jnp.sum(jnp.exp(shifted), axis=-1, keepdims=True))
    out_ref[...] = (shifted - lse).reshape(T, BP, NL).astype(out_ref.dtype)


def _prepack(params, input_size, hidden_size, output_size, nl):
    """One-time weight prepack: transpose, split torch.cat, fuse into one
    128-lane-aligned slab (lanes [0:H)=new_h, [H:H+O)=out1), zero padding."""
    I, H, O = input_size, hidden_size, output_size

    # PyTorch Linear stores weight as [out, in]; transpose to [in, out].
    w_i2h = params["w_i2h"].T          # [I+H, H]
    w_i2o = params["w_i2o"].T          # [I+H, O]
    w_o2o = params["w_o2o"].T          # [H+O, O]

    wih_x, wih_h = w_i2h[:I], w_i2h[I:]
    wio_x, wio_h = w_i2o[:I], w_i2o[I:]
    woo_h, woo_o = w_o2o[:H], w_o2o[H:]

    w_x = jnp.zeros((I, nl), jnp.float32)
    w_x = w_x.at[:, :H].set(wih_x).at[:, H:H + O].set(wio_x)

    # Rows >= H are zero so the full z slab can be carried as hidden state.
    w_h = jnp.zeros((nl, nl), jnp.float32)
    w_h = w_h.at[:H, :H].set(wih_h).at[:H, H:H + O].set(wio_h)

    b_cat = jnp.zeros((1, nl), jnp.float32)
    b_cat = b_cat.at[0, :H].set(params["b_i2h"]).at[0, H:H + O].set(params["b_i2o"])

    w_oo = jnp.zeros((nl, nl), jnp.float32)
    w_oo = w_oo.at[:H, :O].set(woo_h).at[H:H + O, :O].set(woo_o)

    # Padded output lanes get a large negative bias so exp() underflows to 0
    # and they cannot corrupt the log-softmax normalizer.
    b_oo = jnp.full((1, nl), -1e30, jnp.float32)
    b_oo = b_oo.at[0, :O].set(params["b_o2o"])

    return w_x, w_h, b_cat, w_oo, b_oo


@jax.jit
def rnn_evaluate(line_tensor, hidden0, params):
    """Run the RNN over a whole sequence in one fused Pallas kernel.

    Args:
      line_tensor: [T, B, input_size] float32
      hidden0:     [B, hidden_size]   float32
      params:      dict with the PyTorch __init__ parameter shapes.

    Returns:
      (log_probs [T, B, output_size], final_hidden [B, hidden_size])
    """
    T, B, I = line_tensor.shape
    H = hidden0.shape[1]
    O = params["b_o2o"].shape[0]
    NL = _round_up(H + O, 128)         # one 128-lane slab holds new_h | out1
    BP = max(8, _round_up(B, 8))       # full f32 sublane tile

    w_x, w_h, b_cat, w_oo, b_oo = _prepack(params, I, H, O, NL)

    # Hoisted, non-recurrent input projection for all timesteps at once
    # (plain XLA; it does not belong in the serial chain).
    xz = jnp.einsum("tbi,in->tbn", line_tensor, w_x,
                    preferred_element_type=jnp.float32) + b_cat   # [T, B, NL]
    xz_p = jnp.zeros((T, BP, NL), jnp.float32).at[:, :B, :].set(xz)

    h0p = jnp.zeros((BP, NL), jnp.float32).at[:B, :H].set(hidden0)

    vmem = pl.BlockSpec(memory_space=pltpu.MemorySpace.VMEM)
    out_p, hfin = pl.pallas_call(
        _rnn_seq_kernel,
        out_shape=(
            jax.ShapeDtypeStruct((T, BP, NL), jnp.float32),
            jax.ShapeDtypeStruct((BP, NL), jnp.float32),
        ),
        in_specs=[vmem, vmem, vmem, vmem, vmem],
        out_specs=(vmem, vmem),
        scratch_shapes=[pltpu.VMEM((T, BP, NL), jnp.float32)],
    )(xz_p, h0p, w_h, w_oo, b_oo)

    return out_p[:, :B, :O], hfin[:B, :H]


def init_params(key, input_size, hidden_size, output_size):
    """Deterministic synthetic parameters with the PyTorch __init__ shapes."""
    n_categories = 0  # `categories` list in the source module is empty
    in_ih = n_categories + input_size + hidden_size
    in_oo = hidden_size + output_size
    ks = jax.random.split(key, 6)
    scale = 0.1
    return {
        "w_i2h": scale * jax.random.normal(ks[0], (hidden_size, in_ih), jnp.float32),
        "b_i2h": scale * jax.random.normal(ks[1], (hidden_size,), jnp.float32),
        "w_i2o": scale * jax.random.normal(ks[2], (output_size, in_ih), jnp.float32),
        "b_i2o": scale * jax.random.normal(ks[3], (output_size,), jnp.float32),
        "w_o2o": scale * jax.random.normal(ks[4], (output_size, in_oo), jnp.float32),
        "b_o2o": scale * jax.random.normal(ks[5], (output_size,), jnp.float32),
    }


def reference_step(letter_vec, hidden, params):
    """Pure-JAX reference mirroring the PyTorch forward (eval-mode dropout)."""
    cat_ih = jnp.concatenate([letter_vec, hidden], axis=1)
    new_h = cat_ih @ params["w_i2h"].T + params["b_i2h"]
    out = cat_ih @ params["w_i2o"].T + params["b_i2o"]
    comb = jnp.concatenate([new_h, out], axis=1)
    out = comb @ params["w_o2o"].T + params["b_o2o"]
    out = jax.nn.log_softmax(out, axis=1)
    return out, new_h


if __name__ == "__main__":
    key = jax.random.PRNGKey(0)
    B, input_size, hidden_size, output_size = 2, 16, 32, 18
    seq_len = 8

    kp, kx = jax.random.split(key, 2)
    params = init_params(kp, input_size, hidden_size, output_size)
    line_tensor = jax.random.normal(kx, (seq_len, B, input_size), jnp.float32)
    hidden0 = jnp.zeros((B, hidden_size), jnp.float32)

    # `evaluate`: whole sequence in one fused kernel call.
    out_all, h_final = rnn_evaluate(line_tensor, hidden0, params)
    out_all = jax.block_until_ready(out_all)
    h_final = jax.block_until_ready(h_final)

    # Pure-JAX reference: validate EVERY timestep, not just the last.
    h_ref = hidden0
    outs_ref = []
    for t in range(seq_len):
        o_ref, h_ref = reference_step(line_tensor[t], h_ref, params)
        outs_ref.append(o_ref)
    outs_ref = jnp.stack(outs_ref, axis=0)

    assert out_all.shape == (seq_len, B, output_size)
    assert h_final.shape == (B, hidden_size)
    assert jnp.allclose(out_all, outs_ref, atol=1e-4, rtol=1e-4), (
        "max |out diff| = %e" % float(jnp.max(jnp.abs(out_all - outs_ref))))
    assert jnp.allclose(h_final, h_ref, atol=1e-4, rtol=1e-4), (
        "max |h diff| = %e" % float(jnp.max(jnp.abs(h_final - h_ref))))

    print("KERNEL_OK")
</pallas_src>

<mosaic_0001>
module attributes {stable_mosaic.version = 11 : i64} {
  func.func @_rnn_seq_kernel(%arg0: memref<8x8x128xf32, #tpu.memory_space<vmem>>, %arg1: memref<8x128xf32, #tpu.memory_space<vmem>>, %arg2: memref<128x128xf32, #tpu.memory_space<vmem>>, %arg3: memref<128x128xf32, #tpu.memory_space<vmem>>, %arg4: memref<1x128xf32, #tpu.memory_space<vmem>>, %arg5: memref<8x8x128xf32, #tpu.memory_space<vmem>>, %arg6: memref<8x128xf32, #tpu.memory_space<vmem>>, %arg7: memref<8x8x128xf32, #tpu.memory_space<vmem>>) attributes {dimension_semantics = [], scalar_prefetch = 0 : i64, scratch_operands = 1 : i64, tpu.core_type = #tpu.core_type<tc>} {
    %c0 = arith.constant 0 : index
    %c0_0 = arith.constant 0 : index
    %0 = vector.load %arg2[%c0, %c0_0] : memref<128x128xf32, #tpu.memory_space<vmem>>, vector<128x128xf32>
    %c0_1 = arith.constant 0 : index
    %c0_2 = arith.constant 0 : index
    %1 = vector.load %arg1[%c0_1, %c0_2] : memref<8x128xf32, #tpu.memory_space<vmem>>, vector<8x128xf32>
    %c0_i32 = arith.constant 0 : i32
    %2 = arith.index_cast %c0_i32 : i32 to index
    %c0_3 = arith.constant 0 : index
    %c0_4 = arith.constant 0 : index
    %3 = vector.load %arg0[%2, %c0_3, %c0_4] : memref<8x8x128xf32, #tpu.memory_space<vmem>>, vector<1x8x128xf32>
    %4 = vector.shape_cast %3 : vector<1x8x128xf32> to vector<8x128xf32>
    %cst = arith.constant dense<0.000000e+00> : vector<8x128xf32>
    %5 = tpu.matmul %1, %0, %cst {dimension_numbers = #tpu.dot_dimension_numbers<[1], [0], [0], [1], [0, 0, 1, 1], [], []>} : vector<8x128xf32>, vector<128x128xf32>, vector<8x128xf32> -> vector<8x128xf32>
    %6 = arith.addf %4, %5 : vector<8x128xf32>
    %7 = arith.index_cast %c0_i32 : i32 to index
    %c0_5 = arith.constant 0 : index
    %c0_6 = arith.constant 0 : index
    %8 = vector.load %arg7[%7, %c0_5, %c0_6] : memref<8x8x128xf32, #tpu.memory_space<vmem>>, vector<1x8x128xf32>
    %9 = vector.shape_cast %8 : vector<1x8x128xf32> to vector<8x128xf32>
    %10 = vector.shape_cast %6 : vector<8x128xf32> to vector<1x8x128xf32>
    tpu.vector_store %arg7[%7, %c0_5, %c0_6], %10 {strides = array<i32>} : memref<8x8x128xf32, #tpu.memory_space<vmem>>, vector<1x8x128xf32>,
    %c1_i32 = arith.constant 1 : i32
    %11 = arith.index_cast %c1_i32 : i32 to index
    %c0_7 = arith.constant 0 : index
    %c0_8 = arith.constant 0 : index
    %12 = vector.load %arg0[%11, %c0_7, %c0_8] : memref<8x8x128xf32, #tpu.memory_space<vmem>>, vector<1x8x128xf32>
    %13 = vector.shape_cast %12 : vector<1x8x128xf32> to vector<8x128xf32>
    %cst_9 = arith.constant dense<0.000000e+00> : vector<8x128xf32>
    %14 = tpu.matmul %6, %0, %cst_9 {dimension_numbers = #tpu.dot_dimension_numbers<[1], [0], [0], [1], [0, 0, 1, 1], [], []>} : vector<8x128xf32>, vector<128x128xf32>, vector<8x128xf32> -> vector<8x128xf32>
    %15 = arith.addf %13, %14 : vector<8x128xf32>
    %16 = arith.index_cast %c1_i32 : i32 to index
    %c0_10 = arith.constant 0 : index
    %c0_11 = arith.constant 0 : index
    %17 = vector.load %arg7[%16, %c0_10, %c0_11] : memref<8x8x128xf32, #tpu.memory_space<vmem>>, vector<1x8x128xf32>
    %18 = vector.shape_cast %17 : vector<1x8x128xf32> to vector<8x128xf32>
    %19 = vector.shape_cast %15 : vector<8x128xf32> to vector<1x8x128xf32>
    tpu.vector_store %arg7[%16, %c0_10, %c0_11], %19 {strides = array<i32>} : memref<8x8x128xf32, #tpu.memory_space<vmem>>, vector<1x8x128xf32>,
    %c2_i32 = arith.constant 2 : i32
    %20 = arith.index_cast %c2_i32 : i32 to index
    %c0_12 = arith.constant 0 : index
    %c0_13 = arith.constant 0 : index
    %21 = vector.load %arg0[%20, %c0_12, %c0_13] : memref<8x8x128xf32, #tpu.memory_space<vmem>>, vector<1x8x128xf32>
    %22 = vector.shape_cast %21 : vector<1x8x128xf32> to vector<8x128xf32>
    %cst_14 = arith.constant dense<0.000000e+00> : vector<8x128xf32>
    %23 = tpu.matmul %15, %0, %cst_14 {dimension_numbers = #tpu.dot_dimension_numbers<[1], [0], [0], [1], [0, 0, 1, 1], [], []>} : vector<8x128xf32>, vector<128x128xf32>, vector<8x128xf32> -> vector<8x128xf32>
    %24 = arith.addf %22, %23 : vector<8x128xf32>
    %25 = arith.index_cast %c2_i32 : i32 to index
    %c0_15 = arith.constant 0 : index
    %c0_16 = arith.constant 0 : index
    %26 = vector.load %arg7[%25, %c0_15, %c0_16] : memref<8x8x128xf32, #tpu.memory_space<vmem>>, vector<1x8x128xf32>
    %27 = vector.shape_cast %26 : vector<1x8x128xf32> to vector<8x128xf32>
    %28 = vector.shape_cast %24 : vector<8x128xf32> to vector<1x8x128xf32>
    tpu.vector_store %arg7[%25, %c0_15, %c0_16], %28 {strides = array<i32>} : memref<8x8x128xf32, #tpu.memory_space<vmem>>, vector<1x8x128xf32>,
    %c3_i32 = arith.constant 3 : i32
    %29 = arith.index_cast %c3_i32 : i32 to index
    %c0_17 = arith.constant 0 : index
    %c0_18 = arith.constant 0 : index
    %30 = vector.load %arg0[%29, %c0_17, %c0_18] : memref<8x8x128xf32, #tpu.memory_space<vmem>>, vector<1x8x128xf32>
    %31 = vector.shape_cast %30 : vector<1x8x128xf32> to vector<8x128xf32>
    %cst_19 = arith.constant dense<0.000000e+00> : vector<8x128xf32>
    %32 = tpu.matmul %24, %0, %cst_19 {dimension_numbers = #tpu.dot_dimension_numbers<[1], [0], [0], [1], [0, 0, 1, 1], [], []>} : vector<8x128xf32>, vector<128x128xf32>, vector<8x128xf32> -> vector<8x128xf32>
    %33 = arith.addf %31, %32 : vector<8x128xf32>
    %34 = arith.index_cast %c3_i32 : i32 to index
    %c0_20 = arith.constant 0 : index
    %c0_21 = arith.constant 0 : index
    %35 = vector.load %arg7[%34, %c0_20, %c0_21] : memref<8x8x128xf32, #tpu.memory_space<vmem>>, vector<1x8x128xf32>
    %36 = vector.shape_cast %35 : vector<1x8x128xf32> to vector<8x128xf32>
    %37 = vector.shape_cast %33 : vector<8x128xf32> to vector<1x8x128xf32>
    tpu.vector_store %arg7[%34, %c0_20, %c0_21], %37 {strides = array<i32>} : memref<8x8x128xf32, #tpu.memory_space<vmem>>, vector<1x8x128xf32>,
    %c4_i32 = arith.constant 4 : i32
    %38 = arith.index_cast %c4_i32 : i32 to index
    %c0_22 = arith.constant 0 : index
    %c0_23 = arith.constant 0 : index
    %39 = vector.load %arg0[%38, %c0_22, %c0_23] : memref<8x8x128xf32, #tpu.memory_space<vmem>>, vector<1x8x128xf32>
    %40 = vector.shape_cast %39 : vector<1x8x128xf32> to vector<8x128xf32>
    %cst_24 = arith.constant dense<0.000000e+00> : vector<8x128xf32>
    %41 = tpu.matmul %33, %0, %cst_24 {dimension_numbers = #tpu.dot_dimension_numbers<[1], [0], [0], [1], [0, 0, 1, 1], [], []>} : vector<8x128xf32>, vector<128x128xf32>, vector<8x128xf32> -> vector<8x128xf32>
    %42 = arith.addf %40, %41 : vector<8x128xf32>
    %43 = arith.index_cast %c4_i32 : i32 to index
    %c0_25 = arith.constant 0 : index
    %c0_26 = arith.constant 0 : index
    %44 = vector.load %arg7[%43, %c0_25, %c0_26] : memref<8x8x128xf32, #tpu.memory_space<vmem>>, vector<1x8x128xf32>
    %45 = vector.shape_cast %44 : vector<1x8x128xf32> to vector<8x128xf32>
    %46 = vector.shape_cast %42 : vector<8x128xf32> to vector<1x8x128xf32>
    tpu.vector_store %arg7[%43, %c0_25, %c0_26], %46 {strides = array<i32>} : memref<8x8x128xf32, #tpu.memory_space<vmem>>, vector<1x8x128xf32>,
    %c5_i32 = arith.constant 5 : i32
    %47 = arith.index_cast %c5_i32 : i32 to index
    %c0_27 = arith.constant 0 : index
    %c0_28 = arith.constant 0 : index
    %48 = vector.load %arg0[%47, %c0_27, %c0_28] : memref<8x8x128xf32, #tpu.memory_space<vmem>>, vector<1x8x128xf32>
    %49 = vector.shape_cast %48 : vector<1x8x128xf32> to vector<8x128xf32>
    %cst_29 = arith.constant dense<0.000000e+00> : vector<8x128xf32>
    %50 = tpu.matmul %42, %0, %cst_29 {dimension_numbers = #tpu.dot_dimension_numbers<[1], [0], [0], [1], [0, 0, 1, 1], [], []>} : vector<8x128xf32>, vector<128x128xf32>, vector<8x128xf32> -> vector<8x128xf32>
    %51 = arith.addf %49, %50 : vector<8x128xf32>
    %52 = arith.index_cast %c5_i32 : i32 to index
    %c0_30 = arith.constant 0 : index
    %c0_31 = arith.constant 0 : index
    %53 = vector.load %arg7[%52, %c0_30, %c0_31] : memref<8x8x128xf32, #tpu.memory_space<vmem>>, vector<1x8x128xf32>
    %54 = vector.shape_cast %53 : vector<1x8x128xf32> to vector<8x128xf32>
    %55 = vector.shape_cast %51 : vector<8x128xf32> to vector<1x8x128xf32>
    tpu.vector_store %arg7[%52, %c0_30, %c0_31], %55 {strides = array<i32>} : memref<8x8x128xf32, #tpu.memory_space<vmem>>, vector<1x8x128xf32>,
    %c6_i32 = arith.constant 6 : i32
    %56 = arith.index_cast %c6_i32 : i32 to index
    %c0_32 = arith.constant 0 : index
    %c0_33 = arith.constant 0 : index
    %57 = vector.load %arg0[%56, %c0_32, %c0_33] : memref<8x8x128xf32, #tpu.memory_space<vmem>>, vector<1x8x128xf32>
    %58 = vector.shape_cast %57 : vector<1x8x128xf32> to vector<8x128xf32>
    %cst_34 = arith.constant dense<0.000000e+00> : vector<8x128xf32>
    %59 = tpu.matmul %51, %0, %cst_34 {dimension_numbers = #tpu.dot_dimension_numbers<[1], [0], [0], [1], [0, 0, 1, 1], [], []>} : vector<8x128xf32>, vector<128x128xf32>, vector<8x128xf32> -> vector<8x128xf32>
    %60 = arith.addf %58, %59 : vector<8x128xf32>
    %61 = arith.index_cast %c6_i32 : i32 to index
    %c0_35 = arith.constant 0 : index
    %c0_36 = arith.constant 0 : index
    %62 = vector.load %arg7[%61, %c0_35, %c0_36] : memref<8x8x128xf32, #tpu.memory_space<vmem>>, vector<1x8x128xf32>
    %63 = vector.shape_cast %62 : vector<1x8x128xf32> to vector<8x128xf32>
    %64 = vector.shape_cast %60 : vector<8x128xf32> to vector<1x8x128xf32>
    tpu.vector_store %arg7[%61, %c0_35, %c0_36], %64 {strides = array<i32>} : memref<8x8x128xf32, #tpu.memory_space<vmem>>, vector<1x8x128xf32>,
    %c7_i32 = arith.constant 7 : i32
    %65 = arith.index_cast %c7_i32 : i32 to index
    %c0_37 = arith.constant 0 : index
    %c0_38 = arith.constant 0 : index
    %66 = vector.load %arg0[%65, %c0_37, %c0_38] : memref<8x8x128xf32, #tpu.memory_space<vmem>>, vector<1x8x128xf32>
    %67 = vector.shape_cast %66 : vector<1x8x128xf32> to vector<8x128xf32>
    %cst_39 = arith.constant dense<0.000000e+00> : vector<8x128xf32>
    %68 = tpu.matmul %60, %0, %cst_39 {dimension_numbers = #tpu.dot_dimension_numbers<[1], [0], [0], [1], [0, 0, 1, 1], [], []>} : vector<8x128xf32>, vector<128x128xf32>, vector<8x128xf32> -> vector<8x128xf32>
    %69 = arith.addf %67, %68 : vector<8x128xf32>
    %70 = arith.index_cast %c7_i32 : i32 to index
    %c0_40 = arith.constant 0 : index
    %c0_41 = arith.constant 0 : index
    %71 = vector.load %arg7[%70, %c0_40, %c0_41] : memref<8x8x128xf32, #tpu.memory_space<vmem>>, vector<1x8x128xf32>
    %72 = vector.shape_cast %71 : vector<1x8x128xf32> to vector<8x128xf32>
    %73 = vector.shape_cast %69 : vector<8x128xf32> to vector<1x8x128xf32>
    tpu.vector_store %arg7[%70, %c0_40, %c0_41], %73 {strides = array<i32>} : memref<8x8x128xf32, #tpu.memory_space<vmem>>, vector<1x8x128xf32>,
    %c8_i32 = arith.constant 8 : i32
    %c0_42 = arith.constant 0 : index
    %c0_43 = arith.constant 0 : index
    %74 = vector.load %arg6[%c0_42, %c0_43] : memref<8x128xf32, #tpu.memory_space<vmem>>, vector<8x128xf32>
    tpu.vector_store %arg6[%c0_42, %c0_43], %69 {strides = array<i32>} : memref<8x128xf32, #tpu.memory_space<vmem>>, vector<8x128xf32>,
    %c0_44 = arith.constant 0 : index
    %c0_45 = arith.constant 0 : index
    %c0_46 = arith.constant 0 : index
    %75 = vector.load %arg7[%c0_44, %c0_45, %c0_46] : memref<8x8x128xf32, #tpu.memory_space<vmem>>, vector<8x8x128xf32>
    %76 = vector.shape_cast %75 : vector<8x8x128xf32> to vector<64x128xf32>
    %c0_47 = arith.constant 0 : index
    %c0_48 = arith.constant 0 : index
    %77 = vector.load %arg3[%c0_47, %c0_48] : memref<128x128xf32, #tpu.memory_space<vmem>>, vector<128x128xf32>
    %cst_49 = arith.constant dense<0.000000e+00> : vector<64x128xf32>
    %78 = tpu.matmul %76, %77, %cst_49 {dimension_numbers = #tpu.dot_dimension_numbers<[1], [0], [0], [1], [0, 0, 1, 1], [], []>} : vector<64x128xf32>, vector<128x128xf32>, vector<64x128xf32> -> vector<64x128xf32>
    %c0_50 = arith.constant 0 : index
    %c0_51 = arith.constant 0 : index
    %79 = vector.load %arg4[%c0_50, %c0_51] : memref<1x128xf32, #tpu.memory_space<vmem>>, vector<1x128xf32>
    %80 = vector.broadcast %79 : vector<1x128xf32> to vector<64x128xf32>
    %81 = arith.addf %78, %80 : vector<64x128xf32>
    %cst_52 = arith.constant dense<0xFF800000> : vector<64xf32>
    %82 = vector.multi_reduction <maximumf>, %81, %cst_52 [1] : vector<64x128xf32> to vector<64xf32>
    %83 = vector.shape_cast %82 : vector<64xf32> to vector<64x1xf32>
    %84 = vector.broadcast %83 : vector<64x1xf32> to vector<64x128xf32>
    %85 = arith.subf %81, %84 : vector<64x128xf32>
    %86 = math.exp %85 : vector<64x128xf32>
    %cst_53 = arith.constant dense<0.000000e+00> : vector<64xf32>
    %87 = vector.multi_reduction <add>, %86, %cst_53 [1] : vector<64x128xf32> to vector<64xf32>
    %88 = vector.shape_cast %87 : vector<64xf32> to vector<64x1xf32>
    %89 = math.log %88 : vector<64x1xf32>
    %90 = vector.broadcast %89 : vector<64x1xf32> to vector<64x128xf32>
    %91 = arith.subf %85, %90 : vector<64x128xf32>
    %92 = vector.shape_cast %91 : vector<64x128xf32> to vector<8x8x128xf32>
    %c0_54 = arith.constant 0 : index
    %c0_55 = arith.constant 0 : index
    %c0_56 = arith.constant 0 : index
    %93 = vector.load %arg5[%c0_54, %c0_55, %c0_56] : memref<8x8x128xf32, #tpu.memory_space<vmem>>, vector<8x8x128xf32>
    tpu.vector_store %arg5[%c0_54, %c0_55, %c0_56], %92 {strides = array<i32>} : memref<8x8x128xf32, #tpu.memory_space<vmem>>, vector<8x8x128xf32>,
    return
  }
}

</mosaic_0001>

<bundles_post_ra>
// kernel: rnn_evaluate.1
= control target key start
LH: loop header
LB: loop body
LE: loop exit
PB: predicated region body
PF: predicated region fallthrough
CT: control target
= control target key end

     0   :  { %v1396_v0 = vmov 0.0   ;;  %vm1397_vm0 = vmmov 0   ;;  %s1934_s2 = inlined_call_operand.vmem [shape: f32[128,128], index: 2, kind: input, shape index: {}]   ;;  %s1935_s1 = inlined_call_operand.vmem [shape: f32[8,128], index: 1, kind: input, shape index: {}]   ;;  %s1936_s0 = inlined_call_operand.vmem [shape: f32[8,8,128], index: 0, kind: input, shape index: {}]   ;;  %s1937_s3 = inlined_call_operand.vmem [shape: f32[128,128], index: 3, kind: input, shape index: {}]   ;;  %s1938_s4 = inlined_call_operand.vmem [shape: f32[1,128], index: 4, kind: input, shape index: {}]   ;;  %s1939_s6 = inlined_call_operand.vmem [shape: f32[8,128], index: 6, kind: output, shape index: {1}]   ;;  %s1940_s5 = inlined_call_operand.vmem [shape: f32[8,8,128], index: 5, kind: output, shape index: {0}]  }
   0x1   :  { %1038 = vmatprep.subr.mxu1 %v1396_v0  ;;  %v1437_v1 = vld [vmem:[%s1934_s2 + $0x78] sm:$0xff]  ;;  %v1442_v2 = vld [vmem:[%s1934_s2 + $0x70] sm:$0xff]  ;;  %1070 = vmatprep.mubr.msk.f32.mxu1 %vm1397_vm0, %v1396_v0  ;;  %v1452_v3 = vld [vmem:[%s1934_s2 + $0x68] sm:$0xff] }
   0x2   :  { %1039 = vmatpush3.msra.mxu1 %v1437_v1  ;;  %1108 = vmatprep.subr.mxu0 %v1396_v0  ;;  %v1461_v4 = vld [vmem:[%s1934_s2 + $0x60] sm:$0xff]  ;;  %v1470_v5 = vld [vmem:[%s1934_s2 + $0x58] sm:$0xff]  ;;  %v1479_v6 = vld [vmem:[%s1934_s2 + $0x50] sm:$0xff] }
   0x3   :  { %1040 = vmatprep.subr.mxu1 %v1396_v0  ;;  %1109 = vmatpush3.msra.mxu0 %v1437_v1  ;;  %v1488_v7 = vld [vmem:[%s1934_s2 + $0x48] sm:$0xff]  ;;  %v1497_v8 = vld [vmem:[%s1934_s2 + $0x40] sm:$0xff]  ;;  %v1506_v9 = vld [vmem:[%s1934_s2 + $0x38] sm:$0xff] }
   0x4   :  { %1041 = vmatpush3.msra.mxu1 %v1442_v2  ;;  %1110 = vmatprep.subr.mxu0 %v1396_v0  ;;  %v1515_v10 = vld [vmem:[%s1934_s2 + $0x30] sm:$0xff]  ;;  %v1524_v11 = vld [vmem:[%s1934_s2 + $0x28] sm:$0xff]  ;;  %v1533_v12 = vld [vmem:[%s1934_s2 + $0x20] sm:$0xff] }
   0x5   :  { %1042 = vmatprep.subr.mxu1 %v1396_v0  ;;  %1111 = vmatpush3.msra.mxu0 %v1442_v2  ;;  %v1542_v13 = vld [vmem:[%s1934_s2 + $0x18] sm:$0xff]  ;;  %v1551_v14 = vld [vmem:[%s1934_s2 + $0x10] sm:$0xff]  ;;  %v1560_v15 = vld [vmem:[%s1934_s2 + $0x8] sm:$0xff] }
   0x6   :  { %1043 = vmatpush3.msra.mxu1 %v1452_v3  ;;  %1112 = vmatprep.subr.mxu0 %v1396_v0  ;;  %v1569_v16 = vld [vmem:[%s1934_s2] sm:$0xff]  ;;  %v870_v22 = vld [vmem:[%s1936_s0 + $0x8] sm:$0xff]  ;;  %v871_v26 = vld [vmem:[%s1936_s0 + $0x10] sm:$0xff] }
   0x7   :  { %1044 = vmatprep.subr.mxu1 %v1396_v0  ;;  %1113 = vmatpush3.msra.mxu0 %v1452_v3  ;;  %v38_v17 = vld [vmem:[%s1935_s1] sm:$0xff]  ;;  %v872_v30 = vld [vmem:[%s1936_s0 + $0x18] sm:$0xff]  ;;  %v874_v39 = vld [vmem:[%s1936_s0 + $0x28] sm:$0xff] }
   0x8   :  { %1045 = vmatpush3.msra.mxu1 %v1461_v4  ;;  %1114 = vmatprep.subr.mxu0 %v1396_v0  ;;  %v39_v18 = vld [vmem:[%s1936_s0] sm:$0xff]  ;;  %v661_v38 = vld [vmem:[%s1937_s3 + $0x78] sm:$0xff]  ;;  %v660_v43 = vld [vmem:[%s1937_s3 + $0x70] sm:$0xff] }
   0x9   :  { %1046 = vmatprep.subr.mxu1 %v1396_v0  ;;  %1115 = vmatpush3.msra.mxu0 %v1461_v4  ;;  %v873_v34 = vld [vmem:[%s1936_s0 + $0x20] sm:$0xff]  ;;  %v659_v44 = vld [vmem:[%s1937_s3 + $0x68] sm:$0xff]  ;;  %v657_v46 = vld [vmem:[%s1937_s3 + $0x58] sm:$0xff] }
   0xa   :  { %1047 = vmatpush3.msra.mxu1 %v1470_v5  ;;  %1116 = vmatprep.subr.mxu0 %v1396_v0  ;;  %v658_v45 = vld [vmem:[%s1937_s3 + $0x60] sm:$0xff]  ;;  %v656_v47 = vld [vmem:[%s1937_s3 + $0x50] sm:$0xff]  ;;  %v655_v48 = vld [vmem:[%s1937_s3 + $0x48] sm:$0xff] }
   0xb   :  { %1048 = vmatprep.subr.mxu1 %v1396_v0  ;;  %1117 = vmatpush3.msra.mxu0 %v1470_v5  ;;  %v654_v49 = vld [vmem:[%s1937_s3 + $0x40] sm:$0xff]  ;;  %v653_v50 = vld [vmem:[%s1937_s3 + $0x38] sm:$0xff]  ;;  %v652_v51 = vld [vmem:[%s1937_s3 + $0x30] sm:$0xff] }
   0xc   :  { %1049 = vmatpush3.msra.mxu1 %v1479_v6  ;;  %1118 = vmatprep.subr.mxu0 %v1396_v0  ;;  %v651_v52 = vld [vmem:[%s1937_s3 + $0x28] sm:$0xff]  ;;  %v650_v53 = vld [vmem:[%s1937_s3 + $0x20] sm:$0xff]  ;;  %v649_v54 = vld [vmem:[%s1937_s3 + $0x18] sm:$0xff] }
   0xd   :  { %1050 = vmatprep.subr.mxu1 %v1396_v0  ;;  %1119 = vmatpush3.msra.mxu0 %v1479_v6  ;;  %v648_v55 = vld [vmem:[%s1937_s3 + $0x10] sm:$0xff]  ;;  %v647_v56 = vld [vmem:[%s1937_s3 + $0x8] sm:$0xff]  ;;  %v646_v57 = vld [vmem:[%s1937_s3] sm:$0xff] }
   0xe   :  { %1051 = vmatpush3.msra.mxu1 %v1488_v7  ;;  %1120 = vmatprep.subr.mxu0 %v1396_v0  ;;  %v875_v58 = vld [vmem:[%s1936_s0 + $0x30] sm:$0xff]  ;;  %v877_v62 = vld [vmem:[%s1938_s4] ss:$0 sm:$0xff] }
   0xf   :  { %1052 = vmatprep.subr.mxu1 %v1396_v0  ;;  %1121 = vmatpush3.msra.mxu0 %v1488_v7 }
  0x10   :  { %1053 = vmatpush3.msra.mxu1 %v1497_v8  ;;  %1122 = vmatprep.subr.mxu0 %v1396_v0 }
  0x11   :  { %1054 = vmatprep.subr.mxu1 %v1396_v0  ;;  %1123 = vmatpush3.msra.mxu0 %v1497_v8 }
  0x12   :  { %1055 = vmatpush3.msra.mxu1 %v1506_v9  ;;  %1124 = vmatprep.subr.mxu0 %v1396_v0 }
  0x13   :  { %1056 = vmatprep.subr.mxu1 %v1396_v0  ;;  %1125 = vmatpush3.msra.mxu0 %v1506_v9 }
  0x14   :  { %1057 = vmatpush3.msra.mxu1 %v1515_v10  ;;  %1126 = vmatprep.subr.mxu0 %v1396_v0 }
  0x15   :  { %1058 = vmatprep.subr.mxu1 %v1396_v0  ;;  %1127 = vmatpush3.msra.mxu0 %v1515_v10 }
  0x16   :  { %1059 = vmatpush3.msra.mxu1 %v1524_v11  ;;  %1128 = vmatprep.subr.mxu0 %v1396_v0 }
  0x17   :  { %1060 = vmatprep.subr.mxu1 %v1396_v0  ;;  %1129 = vmatpush3.msra.mxu0 %v1524_v11 }
  0x18   :  { %1061 = vmatpush3.msra.mxu1 %v1533_v12  ;;  %1130 = vmatprep.subr.mxu0 %v1396_v0 }
  0x19   :  { %1062 = vmatprep.subr.mxu1 %v1396_v0  ;;  %1131 = vmatpush3.msra.mxu0 %v1533_v12 }
  0x1a   :  { %1063 = vmatpush3.msra.mxu1 %v1542_v13  ;;  %1132 = vmatprep.subr.mxu0 %v1396_v0 }
  0x1b   :  { %1064 = vmatprep.subr.mxu1 %v1396_v0  ;;  %1133 = vmatpush3.msra.mxu0 %v1542_v13 }
  0x1c   :  { %1065 = vmatpush3.msra.mxu1 %v1551_v14  ;;  %1134 = vmatprep.subr.mxu0 %v1396_v0 }
  0x1d   :  { %1066 = vmatprep.subr.mxu1 %v1396_v0  ;;  %1135 = vmatpush3.msra.mxu0 %v1551_v14 }
  0x1e   :  { %1067 = vmatpush3.msra.mxu1 %v1560_v15  ;;  %1136 = vmatprep.subr.mxu0 %v1396_v0 }
  0x1f   :  { %1068 = vmatprep.subr.mxu1 %v1396_v0  ;;  %1137 = vmatpush3.msra.mxu0 %v1560_v15 }
  0x20   :  { %1069 = vmatpush3.msra.mxu1 %v1569_v16  ;;  %1138 = vmatprep.subr.mxu0 %v1396_v0 }
  0x21   :  { %1071 = vmatmul.mubr.f32.vlgmr.msra.gmra.mxu1 %v38_v17  ;;  %1073 = vmatprep.subr.mxu1 %v1396_v0 }
  0x22   :  { %1074 = vmatpush3.msra.mxu1 %v1437_v1  ;;  %1105 = vmatprep.mubr.msk.f32.mxu1 %vm1397_vm0, %v1396_v0 }
  0x23   :  { %1075 = vmatprep.subr.mxu1 %v1396_v0  ;;  %1139 = vmatpush3.msra.mxu0 %v1569_v16 }
  0x24   :  { %1076 = vmatpush3.msra.mxu1 %v1442_v2  ;;  %1140 = vmatprep.mubr.msk.f32.mxu0 %vm1397_vm0, %v1396_v0 }
  0x25   :  { %1077 = vmatprep.subr.mxu1 %v1396_v0  ;;  %1178 = vmatprep.subr.mxu0 %v1396_v0 }
  0x26   :  { %1078 = vmatpush3.msra.mxu1 %v1452_v3 }
  0x27   :  { %1079 = vmatprep.subr.mxu1 %v1396_v0 }
  0x28   :  { %1080 = vmatpush3.msra.mxu1 %v1461_v4 }
  0x29   :  { %1081 = vmatprep.subr.mxu1 %v1396_v0 }
  0x2a   :  { %1082 = vmatpush3.msra.mxu1 %v1470_v5 }
  0x2b   :  { %1083 = vmatprep.subr.mxu1 %v1396_v0 }
  0x2c   :  { %1084 = vmatpush3.msra.mxu1 %v1479_v6 }
  0x2d   :  { %1085 = vmatprep.subr.mxu1 %v1396_v0 }
  0x2e   :  { %1086 = vmatpush3.msra.mxu1 %v1488_v7 }
  0x2f   :  { %1087 = vmatprep.subr.mxu1 %v1396_v0 }
  0x30   :  { %1088 = vmatpush3.msra.mxu1 %v1497_v8 }
  0x31   :  { %1089 = vmatprep.subr.mxu1 %v1396_v0 }
  0x32   :  { %1090 = vmatpush3.msra.mxu1 %v1506_v9 }
  0x33   :  { %1091 = vmatprep.subr.mxu1 %v1396_v0 }
  0x34   :  { %1092 = vmatpush3.msra.mxu1 %v1515_v10 }
  0x35   :  { %1093 = vmatprep.subr.mxu1 %v1396_v0 }
  0x36   :  { %1094 = vmatpush3.msra.mxu1 %v1524_v11 }
  0x37   :  { %1095 = vmatprep.subr.mxu1 %v1396_v0 }
  0x38   :  { %1096 = vmatpush3.msra.mxu1 %v1533_v12 }
  0x39   :  { %1097 = vmatprep.subr.mxu1 %v1396_v0 }
  0x3a   :  { %1098 = vmatpush3.msra.mxu1 %v1542_v13 }
  0x3b   :  { %1099 = vmatprep.subr.mxu1 %v1396_v0 }
  0x3c   :  { %1100 = vmatpush3.msra.mxu1 %v1551_v14 }
  0x3d   :  { %1101 = vmatprep.subr.mxu1 %v1396_v0 }
  0x3e   :  { %1102 = vmatpush3.msra.mxu1 %v1560_v15 }
  0x3f   :  { %1103 = vmatprep.subr.mxu1 %v1396_v0 }
  0x40   :  { %1104 = vmatpush3.msra.mxu1 %v1569_v16 }
  0x41   :  { %1143 = vmatprep.subr.mxu1 %v1396_v0 }
  0xe1   :  { %v106_v19 = vpop.f32.mrf.mxu1 }
  0xe2   :  { %v1623_v20 = vadd.f32 %v106_v19, %v39_v18 }
  0xe3   :  { %v1072_v21 = vpop.f32.mrf.mxu1 }
  0xe4   :  { %1106 = vmatmul.mubr.f32.vlgmr.msra.gmra.mxu1 %v1623_v20 }
  0xe5   :  { %1144 = vmatpush3.msra.mxu1 %v1437_v1  ;;  %1175 = vmatprep.mubr.msk.f32.mxu1 %vm1397_vm0, %v1396_v0 }
  0xe6   :  { %1145 = vmatprep.subr.mxu1 %v1396_v0 }
  0xe7   :  { %1146 = vmatpush3.msra.mxu1 %v1442_v2 }
  0xe8   :  { %1147 = vmatprep.subr.mxu1 %v1396_v0 }
  0xe9   :  { %1148 = vmatpush3.msra.mxu1 %v1452_v3 }
  0xea   :  { %1149 = vmatprep.subr.mxu1 %v1396_v0 }
  0xeb   :  { %1150 = vmatpush3.msra.mxu1 %v1461_v4 }
  0xec   :  { %1151 = vmatprep.subr.mxu1 %v1396_v0 }
  0xed   :  { %1152 = vmatpush3.msra.mxu1 %v1470_v5 }
  0xee   :  { %1153 = vmatprep.subr.mxu1 %v1396_v0 }
  0xef   :  { %1154 = vmatpush3.msra.mxu1 %v1479_v6 }
  0xf0   :  { %1155 = vmatprep.subr.mxu1 %v1396_v0 }
  0xf1   :  { %1156 = vmatpush3.msra.mxu1 %v1488_v7 }
  0xf2   :  { %1157 = vmatprep.subr.mxu1 %v1396_v0 }
  0xf3   :  { %1158 = vmatpush3.msra.mxu1 %v1497_v8 }
  0xf4   :  { %1159 = vmatprep.subr.mxu1 %v1396_v0 }
  0xf5   :  { %1160 = vmatpush3.msra.mxu1 %v1506_v9 }
  0xf6   :  { %1161 = vmatprep.subr.mxu1 %v1396_v0 }
  0xf7   :  { %1162 = vmatpush3.msra.mxu1 %v1515_v10 }
  0xf8   :  { %1163 = vmatprep.subr.mxu1 %v1396_v0 }
  0xf9   :  { %1164 = vmatpush3.msra.mxu1 %v1524_v11 }
  0xfa   :  { %1165 = vmatprep.subr.mxu1 %v1396_v0 }
  0xfb   :  { %1166 = vmatpush3.msra.mxu1 %v1533_v12 }
  0xfc   :  { %1167 = vmatprep.subr.mxu1 %v1396_v0 }
  0xfd   :  { %1168 = vmatpush3.msra.mxu1 %v1542_v13 }
  0xfe   :  { %1169 = vmatprep.subr.mxu1 %v1396_v0 }
  0xff   :  { %1170 = vmatpush3.msra.mxu1 %v1551_v14 }
 0x100   :  { %1171 = vmatprep.subr.mxu1 %v1396_v0 }
 0x101   :  { %1172 = vmatpush3.msra.mxu1 %v1560_v15 }
 0x102   :  { %1173 = vmatprep.subr.mxu1 %v1396_v0 }
 0x103   :  { %1174 = vmatpush3.msra.mxu1 %v1569_v16 }
 0x104   :  { %1213 = vmatprep.subr.mxu1 %v1396_v0 }
 0x1a4   :  { %v180_v23 = vpop.f32.mrf.mxu1 }
 0x1a5   :  { %v1663_v24 = vadd.f32 %v870_v22, %v180_v23 }
 0x1a6   :  { %v1107_v25 = vpop.f32.mrf.mxu1 }
 0x1a7   :  { %1141 = vmatmul.mubr.f32.vlgmr.msra.gmra.mxu0 %v1663_v24 }
 0x1a8   :  { %1179 = vmatpush3.msra.mxu0 %v1437_v1  ;;  %1210 = vmatprep.mubr.msk.f32.mxu0 %vm1397_vm0, %v1396_v0 }
 0x1a9   :  { %1180 = vmatprep.subr.mxu0 %v1396_v0 }
 0x1aa   :  { %1181 = vmatpush3.msra.mxu0 %v1442_v2 }
 0x1ab   :  { %1182 = vmatprep.subr.mxu0 %v1396_v0 }
 0x1ac   :  { %1183 = vmatpush3.msra.mxu0 %v1452_v3 }
 0x1ad   :  { %1184 = vmatprep.subr.mxu0 %v1396_v0 }
 0x1ae   :  { %1185 = vmatpush3.msra.mxu0 %v1461_v4 }
 0x1af   :  { %1186 = vmatprep.subr.mxu0 %v1396_v0 }
 0x1b0   :  { %1187 = vmatpush3.msra.mxu0 %v1470_v5 }
 0x1b1   :  { %1188 = vmatprep.subr.mxu0 %v1396_v0 }
 0x1b2   :  { %1189 = vmatpush3.msra.mxu0 %v1479_v6 }
 0x1b3   :  { %1190 = vmatprep.subr.mxu0 %v1396_v0 }
 0x1b4   :  { %1191 = vmatpush3.msra.mxu0 %v1488_v7 }
 0x1b5   :  { %1192 = vmatprep.subr.mxu0 %v1396_v0 }
 0x1b6   :  { %1193 = vmatpush3.msra.mxu0 %v1497_v8 }
 0x1b7   :  { %1194 = vmatprep.subr.mxu0 %v1396_v0 }
 0x1b8   :  { %1195 = vmatpush3.msra.mxu0 %v1506_v9 }
 0x1b9   :  { %1196 = vmatprep.subr.mxu0 %v1396_v0 }
 0x1ba   :  { %1197 = vmatpush3.msra.mxu0 %v1515_v10 }
 0x1bb   :  { %1198 = vmatprep.subr.mxu0 %v1396_v0 }
 0x1bc   :  { %1199 = vmatpush3.msra.mxu0 %v1524_v11 }
 0x1bd   :  { %1200 = vmatprep.subr.mxu0 %v1396_v0 }
 0x1be   :  { %1201 = vmatpush3.msra.mxu0 %v1533_v12 }
 0x1bf   :  { %1202 = vmatprep.subr.mxu0 %v1396_v0 }
 0x1c0   :  { %1203 = vmatpush3.msra.mxu0 %v1542_v13 }
 0x1c1   :  { %1204 = vmatprep.subr.mxu0 %v1396_v0 }
 0x1c2   :  { %1205 = vmatpush3.msra.mxu0 %v1551_v14 }
 0x1c3   :  { %1206 = vmatprep.subr.mxu0 %v1396_v0 }
 0x1c4   :  { %1207 = vmatpush3.msra.mxu0 %v1560_v15 }
 0x1c5   :  { %1208 = vmatprep.subr.mxu0 %v1396_v0 }
 0x1c6   :  { %1209 = vmatpush3.msra.mxu0 %v1569_v16 }
 0x1c7   :  { %1248 = vmatprep.subr.mxu0 %v1396_v0 }
 0x267   :  { %v255_v27 = vpop.f32.mrf.mxu0 }
 0x268   :  { %v1703_v28 = vadd.f32 %v871_v26, %v255_v27 }
 0x269   :  { %v1142_v29 = vpop.f32.mrf.mxu0 }
 0x26a   :  { %1176 = vmatmul.mubr.f32.vlgmr.msra.gmra.mxu1 %v1703_v28 }
 0x26b   :  { %1214 = vmatpush3.msra.mxu1 %v1437_v1  ;;  %1245 = vmatprep.mubr.msk.f32.mxu1 %vm1397_vm0, %v1396_v0 }
 0x26c   :  { %1215 = vmatprep.subr.mxu1 %v1396_v0 }
 0x26d   :  { %1216 = vmatpush3.msra.mxu1 %v1442_v2 }
 0x26e   :  { %1217 = vmatprep.subr.mxu1 %v1396_v0 }
 0x26f   :  { %1218 = vmatpush3.msra.mxu1 %v1452_v3 }
 0x270   :  { %1219 = vmatprep.subr.mxu1 %v1396_v0 }
 0x271   :  { %1220 = vmatpush3.msra.mxu1 %v1461_v4 }
 0x272   :  { %1221 = vmatprep.subr.mxu1 %v1396_v0 }
 0x273   :  { %1222 = vmatpush3.msra.mxu1 %v1470_v5 }
 0x274   :  { %1223 = vmatprep.subr.mxu1 %v1396_v0 }
 0x275   :  { %1224 = vmatpush3.msra.mxu1 %v1479_v6 }
 0x276   :  { %1225 = vmatprep.subr.mxu1 %v1396_v0 }
 0x277   :  { %1226 = vmatpush3.msra.mxu1 %v1488_v7 }
 0x278   :  { %1227 = vmatprep.subr.mxu1 %v1396_v0 }
 0x279   :  { %1228 = vmatpush3.msra.mxu1 %v1497_v8 }
 0x27a   :  { %1229 = vmatprep.subr.mxu1 %v1396_v0 }
 0x27b   :  { %1230 = vmatpush3.msra.mxu1 %v1506_v9 }
 0x27c   :  { %1231 = vmatprep.subr.mxu1 %v1396_v0 }
 0x27d   :  { %1232 = vmatpush3.msra.mxu1 %v1515_v10 }
 0x27e   :  { %1233 = vmatprep.subr.mxu1 %v1396_v0 }
 0x27f   :  { %1234 = vmatpush3.msra.mxu1 %v1524_v11 }
 0x280   :  { %1235 = vmatprep.subr.mxu1 %v1396_v0 }
 0x281   :  { %1236 = vmatpush3.msra.mxu1 %v1533_v12 }
 0x282   :  { %1237 = vmatprep.subr.mxu1 %v1396_v0 }
 0x283   :  { %1238 = vmatpush3.msra.mxu1 %v1542_v13 }
 0x284   :  { %1239 = vmatprep.subr.mxu1 %v1396_v0 }
 0x285   :  { %1240 = vmatpush3.msra.mxu1 %v1551_v14 }
 0x286   :  { %1241 = vmatprep.subr.mxu1 %v1396_v0 }
 0x287   :  { %1242 = vmatpush3.msra.mxu1 %v1560_v15 }
 0x288   :  { %1243 = vmatprep.subr.mxu1 %v1396_v0 }
 0x289   :  { %1244 = vmatpush3.msra.mxu1 %v1569_v16 }
 0x28a   :  { %1283 = vmatprep.subr.mxu1 %v1396_v0 }
 0x32a   :  { %v330_v31 = vpop.f32.mrf.mxu1 }
 0x32b   :  { %v1743_v32 = vadd.f32 %v872_v30, %v330_v31 }
 0x32c   :  { %v1177_v33 = vpop.f32.mrf.mxu1 }
 0x32d   :  { %1211 = vmatmul.mubr.f32.vlgmr.msra.gmra.mxu0 %v1743_v32 }
 0x32e   :  { %1249 = vmatpush3.msra.mxu0 %v1437_v1  ;;  %1280 = vmatprep.mubr.msk.f32.mxu0 %vm1397_vm0, %v1396_v0 }
 0x32f   :  { %1250 = vmatprep.subr.mxu0 %v1396_v0 }
 0x330   :  { %1251 = vmatpush3.msra.mxu0 %v1442_v2 }
 0x331   :  { %1252 = vmatprep.subr.mxu0 %v1396_v0 }
 0x332   :  { %1253 = vmatpush3.msra.mxu0 %v1452_v3 }
 0x333   :  { %1254 = vmatprep.subr.mxu0 %v1396_v0 }
 0x334   :  { %1255 = vmatpush3.msra.mxu0 %v1461_v4 }
 0x335   :  { %1256 = vmatprep.subr.mxu0 %v1396_v0 }
 0x336   :  { %1257 = vmatpush3.msra.mxu0 %v1470_v5 }
 0x337   :  { %1258 = vmatprep.subr.mxu0 %v1396_v0 }
 0x338   :  { %1259 = vmatpush3.msra.mxu0 %v1479_v6 }
 0x339   :  { %1260 = vmatprep.subr.mxu0 %v1396_v0 }
 0x33a   :  { %1261 = vmatpush3.msra.mxu0 %v1488_v7 }
 0x33b   :  { %1262 = vmatprep.subr.mxu0 %v1396_v0 }
 0x33c   :  { %1263 = vmatpush3.msra.mxu0 %v1497_v8 }
 0x33d   :  { %1264 = vmatprep.subr.mxu0 %v1396_v0 }
 0x33e   :  { %1265 = vmatpush3.msra.mxu0 %v1506_v9 }
 0x33f   :  { %1266 = vmatprep.subr.mxu0 %v1396_v0 }
 0x340   :  { %1267 = vmatpush3.msra.mxu0 %v1515_v10 }
 0x341   :  { %1268 = vmatprep.subr.mxu0 %v1396_v0 }
 0x342   :  { %1269 = vmatpush3.msra.mxu0 %v1524_v11 }
 0x343   :  { %1270 = vmatprep.subr.mxu0 %v1396_v0 }
 0x344   :  { %1271 = vmatpush3.msra.mxu0 %v1533_v12 }
 0x345   :  { %1272 = vmatprep.subr.mxu0 %v1396_v0 }
 0x346   :  { %1273 = vmatpush3.msra.mxu0 %v1542_v13 }
 0x347   :  { %1274 = vmatprep.subr.mxu0 %v1396_v0 }
 0x348   :  { %1275 = vmatpush3.msra.mxu0 %v1551_v14 }
 0x349   :  { %1276 = vmatprep.subr.mxu0 %v1396_v0 }
 0x34a   :  { %1277 = vmatpush3.msra.mxu0 %v1560_v15 }
 0x34b   :  { %1278 = vmatprep.subr.mxu0 %v1396_v0 }
 0x34c   :  { %1279 = vmatpush3.msra.mxu0 %v1569_v16 }
 0x34d   :  { %1318 = vmatprep.subr.mxu0 %v661_v38 }
 0x3ed   :  { %v405_v35 = vpop.f32.mrf.mxu0 }
 0x3ee   :  { %v1782_v36 = vadd.f32 %v873_v34, %v405_v35 }
 0x3ef   :  { %v1212_v37 = vpop.f32.mrf.mxu0 }
 0x3f0   :  { %1246 = vmatmul.mubr.f32.vlgmr.msra.gmra.mxu1 %v1782_v36 }
 0x3f1   :  { %1284 = vmatpush3.msra.mxu1 %v1437_v1  ;;  %1315 = vmatprep.mubr.msk.f32.mxu1 %vm1397_vm0, %v1396_v0 }
 0x3f2   :  { %1285 = vmatprep.subr.mxu1 %v1396_v0 }
 0x3f3   :  { %1286 = vmatpush3.msra.mxu1 %v1442_v2 }
 0x3f4   :  { %1287 = vmatprep.subr.mxu1 %v1396_v0 }
 0x3f5   :  { %1288 = vmatpush3.msra.mxu1 %v1452_v3 }
 0x3f6   :  { %1289 = vmatprep.subr.mxu1 %v1396_v0 }
 0x3f7   :  { %1290 = vmatpush3.msra.mxu1 %v1461_v4 }
 0x3f8   :  { %1291 = vmatprep.subr.mxu1 %v1396_v0 }
 0x3f9   :  { %1292 = vmatpush3.msra.mxu1 %v1470_v5 }
 0x3fa   :  { %1293 = vmatprep.subr.mxu1 %v1396_v0 }
 0x3fb   :  { %1294 = vmatpush3.msra.mxu1 %v1479_v6 }
 0x3fc   :  { %1295 = vmatprep.subr.mxu1 %v1396_v0 }
 0x3fd   :  { %1296 = vmatpush3.msra.mxu1 %v1488_v7 }
 0x3fe   :  { %1297 = vmatprep.subr.mxu1 %v1396_v0 }
 0x3ff   :  { %1298 = vmatpush3.msra.mxu1 %v1497_v8 }
 0x400   :  { %1299 = vmatprep.subr.mxu1 %v1396_v0 }
 0x401   :  { %1300 = vmatpush3.msra.mxu1 %v1506_v9 }
 0x402   :  { %1301 = vmatprep.subr.mxu1 %v1396_v0 }
 0x403   :  { %1302 = vmatpush3.msra.mxu1 %v1515_v10 }
 0x404   :  { %1303 = vmatprep.subr.mxu1 %v1396_v0 }
 0x405   :  { %1304 = vmatpush3.msra.mxu1 %v1524_v11  ;;  %v876_v11 = vld [vmem:[%s1936_s0 + $0x38] sm:$0xff] }
 0x406   :  { %1305 = vmatprep.subr.mxu1 %v1396_v0 }
 0x407   :  { %1306 = vmatpush3.msra.mxu1 %v1533_v12 }
 0x408   :  { %1307 = vmatprep.subr.mxu1 %v1396_v0 }
 0x409   :  { %1308 = vmatpush3.msra.mxu1 %v1542_v13 }
 0x40a   :  { %1309 = vmatprep.subr.mxu1 %v1396_v0 }
 0x40b   :  { %1310 = vmatpush3.msra.mxu1 %v1551_v14 }
 0x40c   :  { %1311 = vmatprep.subr.mxu1 %v1396_v0 }
 0x40d   :  { %1312 = vmatpush3.msra.mxu1 %v1560_v15 }
 0x40e   :  { %1313 = vmatprep.subr.mxu1 %v1396_v0 }
 0x40f   :  { %1314 = vmatpush3.msra.mxu1 %v1569_v16 }
 0x4b0   :  { %v480_v40 = vpop.f32.mrf.mxu1 }
 0x4b1   :  { %v484_v41 = vadd.f32 %v874_v39, %v480_v40 }
 0x4b2   :  { %v1247_v42 = vpop.f32.mrf.mxu1 }
 0x4b3   :  { %1281 = vmatmul.mubr.f32.vlgmr.msra.gmra.mxu0 %v484_v41 }
 0x4b4   :  { %1319 = vmatpush3.msra.mxu0 %v661_v38  ;;  %1350 = vmatprep.mubr.f32.mxu0 %v1623_v20 }
 0x4b5   :  { %1320 = vmatprep.subr.mxu0 %v660_v43 }
 0x4b6   :  { %1321 = vmatpush3.msra.mxu0 %v660_v43 }
 0x4b7   :  { %1322 = vmatprep.subr.mxu0 %v659_v44 }
 0x4b8   :  { %1323 = vmatpush3.msra.mxu0 %v659_v44 }
 0x4b9   :  { %1324 = vmatprep.subr.mxu0 %v658_v45 }
 0x4ba   :  { %1325 = vmatpush3.msra.mxu0 %v658_v45 }
 0x4bb   :  { %1326 = vmatprep.subr.mxu0 %v657_v46 }
 0x4bc   :  { %1327 = vmatpush3.msra.mxu0 %v657_v46 }
 0x4bd   :  { %1328 = vmatprep.subr.mxu0 %v656_v47 }
 0x4be   :  { %1329 = vmatpush3.msra.mxu0 %v656_v47 }
 0x4bf   :  { %1330 = vmatprep.subr.mxu0 %v655_v48 }
 0x4c0   :  { %1331 = vmatpush3.msra.mxu0 %v655_v48 }
 0x4c1   :  { %1332 = vmatprep.subr.mxu0 %v654_v49 }
 0x4c2   :  { %1333 = vmatpush3.msra.mxu0 %v654_v49 }
 0x4c3   :  { %1334 = vmatprep.subr.mxu0 %v653_v50 }
 0x4c4   :  { %1335 = vmatpush3.msra.mxu0 %v653_v50 }
 0x4c5   :  { %1336 = vmatprep.subr.mxu0 %v652_v51 }
 0x4c6   :  { %1337 = vmatpush3.msra.mxu0 %v652_v51 }
 0x4c7   :  { %1338 = vmatprep.subr.mxu0 %v651_v52 }
 0x4c8   :  { %1339 = vmatpush3.msra.mxu0 %v651_v52 }
 0x4c9   :  { %1340 = vmatprep.subr.mxu0 %v650_v53 }
 0x4ca   :  { %1341 = vmatpush3.msra.mxu0 %v650_v53 }
 0x4cb   :  { %1342 = vmatprep.subr.mxu0 %v649_v54 }
 0x4cc   :  { %1343 = vmatpush3.msra.mxu0 %v649_v54 }
 0x4cd   :  { %1344 = vmatprep.subr.mxu0 %v648_v55 }
 0x4ce   :  { %1345 = vmatpush3.msra.mxu0 %v648_v55 }
 0x4cf   :  { %1346 = vmatprep.subr.mxu0 %v647_v56 }
 0x4d0   :  { %1347 = vmatpush3.msra.mxu0 %v647_v56 }
 0x4d1   :  { %1348 = vmatprep.subr.mxu0 %v646_v57 }
 0x4d2   :  { %1349 = vmatpush3.msra.mxu0 %v646_v57 }
 0x4d3   :  { %1351 = vmatmul.mubr.f32.vlgmr.msra.gmra.mxu0 %v1663_v24 }
 0x4d4   :  { %1353 = vmatprep.mubr.f32.mxu0 %v1703_v28 }
 0x4d7   :  { %1354 = vmatmul.mubr.f32.gmra.mxu0 %v1743_v32 }
 0x4d8   :  { %1356 = vmatprep.mubr.f32.mxu0 %v1782_v36 }
 0x4db   :  { %1357 = vmatmul.mubr.f32.gmra.mxu0 %v484_v41 }
 0x573   :  { %v555_v59 = vpop.f32.mrf.mxu0 }
 0x574   :  { %v559_v60 = vadd.f32 %v875_v58, %v555_v59 }
 0x575   :  { %v1282_v61 = vpop.f32.mrf.mxu0 }
 0x576   :  { %1316 = vmatmul.mubr.f32.vlgmr.msra.gmra.mxu1 %v559_v60  ;;  %1359 = vmatprep.mubr.f32.mxu0 %v559_v60 }
 0x593   :  { %v1352_v63 = vpop.f32.mrf.mxu0 }
 0x594   :  { %v741_v0 = vadd.f32 %v1352_v63, %v877_v62 }
 0x595   :  { %v735_v1 = vpop.f32.mrf.mxu0 }
 0x596   :  { %776 = vmax.xlane.f32.xlu0 %v741_v0  ;;  %v736_v3 = vadd.f32 %v877_v62, %v735_v1 }
 0x597   :  { %v1355_v2 = vpop.f32.mrf.mxu0 }
 0x598   :  { %v751_v4 = vadd.f32 %v1355_v2, %v877_v62 }
 0x599   :  { %v745_v5 = vpop.f32.mrf.mxu0 }
 0x59a   :  { %780 = vmax.xlane.f32.xlu1 %v751_v4  ;;  %774 = vmax.xlane.f32.xlu0 %v736_v3  ;;  %v746_v7 = vadd.f32 %v877_v62, %v745_v5 }
 0x59b   :  { %v1358_v6 = vpop.f32.mrf.mxu0 }
 0x59c   :  { %v761_v10 = vadd.f32 %v1358_v6, %v877_v62 }
 0x59d   :  { %v755_v8 = vpop.f32.mrf.mxu0 }
 0x59e   :  { %v756_v9 = vadd.f32 %v877_v62, %v755_v8  ;;  %778 = vmax.xlane.f32.xlu1 %v746_v7 }
 0x5a0   :  { %782 = vmax.xlane.f32.xlu0 %v756_v9 }
 0x5a2   :  { %784 = vmax.xlane.f32.xlu1 %v761_v10 }
 0x61f   :  { %v777_v15 = vpop.xlane.xlu0 %776 }
 0x620   :  { %v1886_v19 = vsub.f32 %v741_v0, %v777_v15 }
 0x622   :  { %v800_v21 = vmul.f32 1.442695, %v1886_v19 }
 0x623   :  { %v781_v16 = vpop.xlane.xlu1 %780  ;;  %v775_v17 = vpop.xlane.xlu0 %774 }
 0x624   :  { %v1888_v20 = vsub.f32 %v736_v3, %v775_v17  ;;  %v1891_v22 = vsub.f32 %v751_v4, %v781_v16  ;;  %1364 = vpow2.f32 %v800_v21 }
 0x626   :  { %v798_v24 = vmul.f32 1.442695, %v1888_v20  ;;  %v804_v27 = vmul.f32 1.442695, %v1891_v22 }
 0x627   :  { %v779_v18 = vpop.xlane.xlu1 %778 }
 0x628   :  { %v1894_v25 = vsub.f32 %v746_v7, %v779_v18  ;;  %1366 = vpow2.f32 %v798_v24 }
 0x629   :  { %v783_v26 = vpop.xlane.xlu0 %782  ;;  %1368 = vpow2.f32 %v804_v27 }
 0x62a   :  { %v802_v29 = vmul.f32 1.442695, %v1894_v25  ;;  %v1900_v30 = vsub.f32 %v756_v9, %v783_v26 }
 0x62b   :  { %v785_v23 = vpop.xlane.xlu1 %784 }
 0x62c   :  { %v1897_v28 = vsub.f32 %v761_v10, %v785_v23  ;;  %1370 = vpow2.f32 %v802_v29  ;;  %v806_v32 = vmul.f32 1.442695, %v1900_v30 }
 0x62e   :  { %v808_v31 = vmul.f32 1.442695, %v1897_v28 }
 0x630   :  { %1372 = vpow2.f32 %v808_v31 }
 0x631   :  { %1374 = vpow2.f32 %v806_v32  ;;  %v1365_v37 = vpop.eup %1364 }
 0x635   :  { %v1367_v38 = vpop.eup %1366 }
 0x636   :  { %v630_v12 = vpop.f32.mrf.mxu1  ;;  %v1369_v39 = vpop.eup %1368 }
 0x637   :  { %v634_v13 = vadd.f32 %v876_v11, %v630_v12 }
 0x638   :  { %v1317_v14 = vpop.f32.mrf.mxu1 }
 0x639   :  { %637 = vst [vmem:[%s1939_s6] sm:$0xff] %v634_v13  ;;  %1360 = vmatmul.mubr.f32.gmra.mxu0 %v634_v13  ;;  %v1371_v40 = vpop.eup %1370 }
 0x63d   :  { %v1373_v41 = vpop.eup %1372 }
 0x63e   :  { %v1375_v42 = vpop.eup %1374 }
 0x6f9   :  { %v1361_v33 = vpop.f32.mrf.mxu0 }
 0x6fa   :  { %v771_v34 = vadd.f32 %v1361_v33, %v877_v62 }
 0x6fb   :  { %v765_v35 = vpop.f32.mrf.mxu0 }
 0x6fc   :  { %v766_v36 = vadd.f32 %v877_v62, %v765_v35  ;;  %788 = vmax.xlane.f32.xlu1 %v771_v34 }
 0x6fe   :  { %786 = vmax.xlane.f32.xlu0 %v766_v36 }
 0x700   :  { %816 = vadd.xlane.f32.xlu1 %v1365_v37 }
 0x702   :  { %814 = vadd.xlane.f32.xlu0 %v1367_v38 }
 0x704   :  { %820 = vadd.xlane.f32.xlu1 %v1369_v39 }
 0x706   :  { %818 = vadd.xlane.f32.xlu0 %v1371_v40 }
 0x708   :  { %824 = vadd.xlane.f32.xlu1 %v1373_v41 }
 0x70a   :  { %822 = vadd.xlane.f32.xlu0 %v1375_v42 }
 0x785   :  { %v789_v43 = vpop.xlane.xlu1 %788 }
 0x786   :  { %v797_v44 = vsub.f32 %v771_v34, %v789_v43 }
 0x787   :  { %v787_v45 = vpop.xlane.xlu0 %786 }
 0x788   :  { %v812_v46 = vmul.f32 1.442695, %v797_v44  ;;  %v796_v47 = vsub.f32 %v766_v36, %v787_v45 }
 0x789   :  { %v817_v48 = vpop.xlane.xlu1 %816 }
 0x78a   :  { %1376 = vpow2.f32 %v812_v46  ;;  %v810_v49 = vmul.f32 1.442695, %v796_v47 }
 0x78b   :  { %1378 = vlog2.f32 %v817_v48  ;;  %v815_v50 = vpop.xlane.xlu0 %814 }
 0x78c   :  { %1380 = vpow2.f32 %v810_v49 }
 0x78d   :  { %1382 = vlog2.f32 %v815_v50  ;;  %v821_v51 = vpop.xlane.xlu1 %820 }
 0x78e   :  { %1384 = vlog2.f32 %v821_v51 }
 0x78f   :  { %v819_v52 = vpop.xlane.xlu0 %818 }
 0x790   :  { %1386 = vlog2.f32 %v819_v52 }
 0x791   :  { %v825_v53 = vpop.xlane.xlu1 %824 }
 0x792   :  { %1388 = vlog2.f32 %v825_v53 }
 0x793   :  { %v823_v54 = vpop.xlane.xlu0 %822 }
 0x794   :  { %1390 = vlog2.f32 %v823_v54 }
 0x797   :  { %v1377_v55 = vpop.eup %1376 }
 0x798   :  { %v1379_v56 = vpop.eup %1378  ;;  %828 = vadd.xlane.f32.xlu1 %v1377_v55 }
 0x799   :  { %v1381_v57 = vpop.eup %1380  ;;  %v833_v58 = vmul.f32 0.6931472, %v1379_v56 }
 0x79a   :  { %v1383_v59 = vpop.eup %1382  ;;  %826 = vadd.xlane.f32.xlu0 %v1381_v57 }
 0x79b   :  { %v1385_v60 = vpop.eup %1384  ;;  %v847_v61 = vsub.f32 %v1886_v19, %v833_v58  ;;  %v831_v62 = vmul.f32 0.6931472, %v1383_v59 }
 0x79c   :  { %v837_v63 = vmul.f32 0.6931472, %v1385_v60 }
 0x79d   :  { %v1387_v0 = vpop.eup %1386  ;;  %855 = vst [vmem:[%s1940_s5 + $0x8] sm:$0xff] %v847_v61  ;;  %v846_v1 = vsub.f32 %v1888_v20, %v831_v62 }
 0x79e   :  { %v849_v2 = vsub.f32 %v1891_v22, %v837_v63  ;;  %v835_v3 = vmul.f32 0.6931472, %v1387_v0 }
 0x79f   :  { %v1389_v4 = vpop.eup %1388  ;;  %854 = vst [vmem:[%s1940_s5] sm:$0xff] %v846_v1 }
 0x7a0   :  { %857 = vst [vmem:[%s1940_s5 + $0x18] sm:$0xff] %v849_v2  ;;  %v848_v5 = vsub.f32 %v1894_v25, %v835_v3  ;;  %v841_v6 = vmul.f32 0.6931472, %v1389_v4 }
 0x7a1   :  { %v1391_v7 = vpop.eup %1390 }
 0x7a2   :  { %856 = vst [vmem:[%s1940_s5 + $0x10] sm:$0xff] %v848_v5  ;;  %v851_v8 = vsub.f32 %v1897_v28, %v841_v6  ;;  %v839_v9 = vmul.f32 0.6931472, %v1391_v7 }
 0x7a4   :  { %859 = vst [vmem:[%s1940_s5 + $0x28] sm:$0xff] %v851_v8  ;;  %v850_v10 = vsub.f32 %v1900_v30, %v839_v9 }
 0x7a6   :  { %858 = vst [vmem:[%s1940_s5 + $0x20] sm:$0xff] %v850_v10 }
 0x821   :  { %v829_v11 = vpop.xlane.xlu1 %828 }
 0x822   :  { %1392 = vlog2.f32 %v829_v11 }
 0x823   :  { %v827_v12 = vpop.xlane.xlu0 %826 }
 0x824   :  { %1394 = vlog2.f32 %v827_v12 }
 0x82f   :  { %v1393_v13 = vpop.eup %1392 }
 0x830   :  { %v845_v14 = vmul.f32 0.6931472, %v1393_v13 }
 0x831   :  { %v1395_v15 = vpop.eup %1394 }
 0x832   :  { %v853_v16 = vsub.f32 %v797_v44, %v845_v14  ;;  %v843_v17 = vmul.f32 0.6931472, %v1395_v15 }
 0x834   :  { %861 = vst [vmem:[%s1940_s5 + $0x38] sm:$0xff] %v853_v16  ;;  %v852_v18 = vsub.f32 %v796_v47, %v843_v17 }
 0x836   :  { %860 = vst [vmem:[%s1940_s5 + $0x30] sm:$0xff] %v852_v18 }

</bundles_post_ra>
